<compile_context>
chip_gen: v7x
topology: tpu7x:2x2x1
jax: 0.10.0
libtpu: 0.0.40
codegen_flags: <defaults>
</compile_context>

<pallas_src>
import functools

import jax
import jax.numpy as jnp
import numpy as np
from jax.experimental import pallas as pl
from jax.experimental.pallas import tpu as pltpu


# ----------------------------- Pallas kernel ------------------------------ #
def relukan_stack_kernel(x_ref, *refs, num_layers, use_bf16):
    """Fused forward of the whole ReLUKAN stack for one batch tile.

    x_ref  : (TB, width[0])                     input features (f32)
    refs   : per layer (plo_flat, phh_flat, Wflat, bias2d), then o_ref
             plo_flat/phh_flat : (1, in*G)      phases, flattened as j = m*in+i
             Wflat             : (in*G, out)    conv weight, reshape-quirk
                                                permuted, r^2 folded in
             bias2d            : (1, out)
    o_ref  : (TB, width[-1])                    output (f32)
    """
    o_ref = refs[-1]
    h = x_ref[...]                                        # (TB, in0) f32
    for li in range(num_layers):
        plo_ref, phh_ref, w_ref, b_ref = refs[4 * li:4 * li + 4]
        in_size = h.shape[1]
        G = plo_ref.shape[1] // in_size

        # Lane-replicate the activations so column j = m*in + i holds h[:, i].
        h_exp = jnp.concatenate([h] * G, axis=-1)         # (TB, in*G)

        # Basis expansion on full slabs (VPU-friendly, no tiny slices).
        x1 = jnp.maximum(h_exp - plo_ref[...], 0.0)       # (TB, in*G)
        x2 = jnp.maximum(phh_ref[...] - h_exp, 0.0)       # (TB, in*G)
        phi = x1 * x2
        phi = phi * phi                                   # r^2 folded into Wflat

        w = w_ref[...]                                    # (in*G, out)
        if use_bf16:                                      # v6e/v7x MXU fast path
            phi = phi.astype(jnp.bfloat16)
            w = w.astype(jnp.bfloat16)

        # Single fused matmul per layer, f32 accumulation.
        h = jnp.dot(phi, w, preferred_element_type=jnp.float32) + b_ref[...]
    o_ref[...] = h.astype(o_ref.dtype)


def relukan_forward(x, params, *, use_bf16_matmul=False, max_batch_tile=256):
    """x: (B, width[0]) f32 -> (B, width[-1], 1), matching torch output shape."""
    B, in0 = x.shape
    out_last = params[-1]['out_size']

    # Batch tile: multiple of 8 sublanes; capped at 256 rows so the
    # double-buffered x/out tiles + resident weights fit comfortably inside
    # the scoped VMEM limit even on v7x (64 MiB physical).
    if B <= max_batch_tile:
        tb = max(8, ((B + 7) // 8) * 8)
    else:
        tb = max_batch_tile
    b_pad = pl.cdiv(B, tb) * tb
    xp = x if b_pad == B else jnp.pad(x, ((0, b_pad - B), (0, 0)))

    flat_args = []
    in_specs = [pl.BlockSpec((tb, in0), lambda i: (i, 0))]
    for p in params:
        for arr in (p['plo_flat'], p['phh_flat'], p['Wflat'], p['b2d']):
            flat_args.append(arr)
            in_specs.append(pl.BlockSpec(arr.shape, lambda i: (0, 0)))

    kern = functools.partial(relukan_stack_kernel,
                             num_layers=len(params),
                             use_bf16=use_bf16_matmul)
    out = pl.pallas_call(
        kern,
        out_shape=jax.ShapeDtypeStruct((b_pad, out_last), jnp.float32),
        grid=(b_pad // tb,),
        in_specs=in_specs,
        out_specs=pl.BlockSpec((tb, out_last), lambda i: (i, 0)),
        compiler_params=pltpu.CompilerParams(
            dimension_semantics=("parallel",)),   # 2 TCs on v7x each take tiles
    )(xp, *flat_args)
    return out[:B, :, None]


# --------------------------- parameter plumbing ---------------------------- #
def init_relukan_params(width, g, k, key):
    """Deterministic parameter init matching the module's __init__ shapes."""
    params = []
    G = g + k
    r = 4.0 * g * g / ((k + 1) * (k + 1))
    for idx in range(len(width) - 1):
        in_size, out_size = width[idx], width[idx + 1]

        phase_low = np.arange(-k, g, dtype=np.float32) / g            # (G,)
        phase_low = np.tile(phase_low[None, :], (in_size, 1))         # (in, G)
        phase_height = phase_low + (k + 1) / g

        key, kw, kb = jax.random.split(key, 3)
        fan_in = G * in_size
        bound = 1.0 / np.sqrt(fan_in)
        # Conv2d(1, out, (g+k, in)) weight: (out, 1, G, in); bias: (out,)
        W = jax.random.uniform(kw, (out_size, 1, G, in_size),
                               minval=-bound, maxval=bound, dtype=jnp.float32)
        b = jax.random.uniform(kb, (out_size,),
                               minval=-bound, maxval=bound, dtype=jnp.float32)

        # torch reshape quirk: basis row-major flat index t = i*G + m (of the
        # (in, G) basis) lines up with W[o, 0].reshape(-1)[t].  The kernel
        # flattens the basis as j = m*in + i (lane-replication order), so
        # permute accordingly, pre-flatten to (in*G, out) and fold r^2 in.
        Wnp = np.asarray(W)
        Wflat = (Wnp.reshape(out_size, G * in_size).T        # [t, o], t=i*G+m
                    .reshape(in_size, G, out_size)           # [i, m, o]
                    .transpose(1, 0, 2)                      # [m, i, o]
                    .reshape(G * in_size, out_size)          # [j, o], j=m*in+i
                 ) * (r * r)
        plo_flat = phase_low.T.reshape(1, G * in_size)       # [0, m*in+i]
        phh_flat = phase_height.T.reshape(1, G * in_size)

        params.append(dict(
            plo=jnp.asarray(phase_low), phh=jnp.asarray(phase_height),
            W=W, b=b, r=r, in_size=in_size, out_size=out_size, G=G,
            plo_flat=jnp.asarray(plo_flat), phh_flat=jnp.asarray(phh_flat),
            Wflat=jnp.asarray(Wflat, dtype=jnp.float32),
            b2d=b.reshape(1, out_size)))
    return params


# ----------------------------- pure-JAX reference -------------------------- #
def ref_forward(x, params, g, k):
    G = g + k
    h = x[:, :, None]                                    # unsqueeze(-1)
    for p in params:
        x1 = jnp.maximum(h - p['plo'][None], 0.0)        # (B, in, G)
        x2 = jnp.maximum(p['phh'][None] - h, 0.0)
        phi = x1 * x2 * p['r']
        phi = phi * phi
        flat = phi.reshape(phi.shape[0], 1, G, p['in_size'])   # reshape quirk
        out = jnp.einsum('bihw,cihw->bc', flat, p['W']) + p['b']
        h = out[:, :, None]
    return h


# --------------------------------- main ------------------------------------ #
if __name__ == "__main__":
    key = jax.random.PRNGKey(0)
    width = [4, 16, 8]          # ReLUKAN(width=[4,16,8], grid=5, k=3)
    g, k = 5, 3
    B = 4

    key, kp, kx = jax.random.split(key, 3)
    params = init_relukan_params(width, g, k, kp)
    x = jax.random.normal(kx, (B, width[0]), dtype=jnp.float32)

    ref = ref_forward(x, params, g, k)

    # f32 path (default; exact-ish vs reference)
    out = jax.block_until_ready(relukan_forward(x, params))
    assert out.shape == (B, width[-1], 1)
    np.testing.assert_allclose(np.asarray(out), np.asarray(ref),
                               rtol=1e-4, atol=1e-4)

    # bf16-operand matmul path (v6e/v7x MXU fast path), f32 accumulation
    out_bf16 = jax.block_until_ready(
        relukan_forward(x, params, use_bf16_matmul=True))
    np.testing.assert_allclose(np.asarray(out_bf16), np.asarray(ref),
                               rtol=5e-2, atol=5e-2)

    print("KERNEL_OK")
</pallas_src>

<mosaic_0001>
module attributes {stable_mosaic.version = 11 : i64} {
  func.func @relukan_stack_kernel(%arg0: i32, %arg1: memref<8x4xf32, #tpu.memory_space<vmem>>, %arg2: memref<1x32xf32, #tpu.memory_space<vmem>>, %arg3: memref<1x32xf32, #tpu.memory_space<vmem>>, %arg4: memref<32x16xf32, #tpu.memory_space<vmem>>, %arg5: memref<1x16xf32, #tpu.memory_space<vmem>>, %arg6: memref<1x128xf32, #tpu.memory_space<vmem>>, %arg7: memref<1x128xf32, #tpu.memory_space<vmem>>, %arg8: memref<128x8xf32, #tpu.memory_space<vmem>>, %arg9: memref<1x8xf32, #tpu.memory_space<vmem>>, %arg10: memref<8x8xf32, #tpu.memory_space<vmem>>) attributes {dimension_semantics = [#tpu.dimension_semantics<parallel>], iteration_bounds = array<i64: 1>, scalar_prefetch = 0 : i64, scratch_operands = 0 : i64, tpu.core_type = #tpu.core_type<tc>, window_params = [{transform_indices = @transform_0, window_bounds = array<i64: 8, 4>}, {pipeline_mode = #tpu.pipeline_mode<synchronous>, transform_indices = @transform_1, window_bounds = array<i64: 1, 32>}, {pipeline_mode = #tpu.pipeline_mode<synchronous>, transform_indices = @transform_2, window_bounds = array<i64: 1, 32>}, {pipeline_mode = #tpu.pipeline_mode<synchronous>, transform_indices = @transform_3, window_bounds = array<i64: 32, 16>}, {pipeline_mode = #tpu.pipeline_mode<synchronous>, transform_indices = @transform_4, window_bounds = array<i64: 1, 16>}, {pipeline_mode = #tpu.pipeline_mode<synchronous>, transform_indices = @transform_5, window_bounds = array<i64: 1, 128>}, {pipeline_mode = #tpu.pipeline_mode<synchronous>, transform_indices = @transform_6, window_bounds = array<i64: 1, 128>}, {pipeline_mode = #tpu.pipeline_mode<synchronous>, transform_indices = @transform_7, window_bounds = array<i64: 128, 8>}, {pipeline_mode = #tpu.pipeline_mode<synchronous>, transform_indices = @transform_8, window_bounds = array<i64: 1, 8>}, {transform_indices = @transform_9, window_bounds = array<i64: 8, 8>}]} {
    %c0 = arith.constant 0 : index
    %c0_0 = arith.constant 0 : index
    %0 = vector.load %arg1[%c0, %c0_0] : memref<8x4xf32, #tpu.memory_space<vmem>>, vector<8x4xf32>
    %1 = tpu.concatenate %0, %0, %0, %0, %0, %0, %0, %0 in 1 : vector<8x4xf32>, vector<8x4xf32>, vector<8x4xf32>, vector<8x4xf32>, vector<8x4xf32>, vector<8x4xf32>, vector<8x4xf32>, vector<8x4xf32> -> vector<8x32xf32>
    %c0_1 = arith.constant 0 : index
    %c0_2 = arith.constant 0 : index
    %2 = vector.load %arg2[%c0_1, %c0_2] : memref<1x32xf32, #tpu.memory_space<vmem>>, vector<1x32xf32>
    %3 = vector.broadcast %2 : vector<1x32xf32> to vector<8x32xf32>
    %4 = arith.subf %1, %3 : vector<8x32xf32>
    %cst = arith.constant 0.000000e+00 : f32
    %5 = vector.broadcast %cst : f32 to vector<8x32xf32>
    %6 = arith.maximumf %4, %5 : vector<8x32xf32>
    %c0_3 = arith.constant 0 : index
    %c0_4 = arith.constant 0 : index
    %7 = vector.load %arg3[%c0_3, %c0_4] : memref<1x32xf32, #tpu.memory_space<vmem>>, vector<1x32xf32>
    %8 = vector.broadcast %7 : vector<1x32xf32> to vector<8x32xf32>
    %9 = arith.subf %8, %1 : vector<8x32xf32>
    %cst_5 = arith.constant 0.000000e+00 : f32
    %10 = vector.broadcast %cst_5 : f32 to vector<8x32xf32>
    %11 = arith.maximumf %9, %10 : vector<8x32xf32>
    %12 = arith.mulf %6, %11 : vector<8x32xf32>
    %13 = arith.mulf %12, %12 : vector<8x32xf32>
    %c0_6 = arith.constant 0 : index
    %c0_7 = arith.constant 0 : index
    %14 = vector.load %arg4[%c0_6, %c0_7] : memref<32x16xf32, #tpu.memory_space<vmem>>, vector<32x16xf32>
    %cst_8 = arith.constant dense<0.000000e+00> : vector<8x16xf32>
    %15 = tpu.matmul %13, %14, %cst_8 {dimension_numbers = #tpu.dot_dimension_numbers<[1], [0], [0], [1], [0, 0, 1, 1], [], []>} : vector<8x32xf32>, vector<32x16xf32>, vector<8x16xf32> -> vector<8x16xf32>
    %c0_9 = arith.constant 0 : index
    %c0_10 = arith.constant 0 : index
    %16 = vector.load %arg5[%c0_9, %c0_10] : memref<1x16xf32, #tpu.memory_space<vmem>>, vector<1x16xf32>
    %17 = vector.broadcast %16 : vector<1x16xf32> to vector<8x16xf32>
    %18 = arith.addf %15, %17 : vector<8x16xf32>
    %19 = tpu.concatenate %18, %18, %18, %18, %18, %18, %18, %18 in 1 : vector<8x16xf32>, vector<8x16xf32>, vector<8x16xf32>, vector<8x16xf32>, vector<8x16xf32>, vector<8x16xf32>, vector<8x16xf32>, vector<8x16xf32> -> vector<8x128xf32>
    %c0_11 = arith.constant 0 : index
    %c0_12 = arith.constant 0 : index
    %20 = vector.load %arg6[%c0_11, %c0_12] : memref<1x128xf32, #tpu.memory_space<vmem>>, vector<1x128xf32>
    %21 = vector.broadcast %20 : vector<1x128xf32> to vector<8x128xf32>
    %22 = arith.subf %19, %21 : vector<8x128xf32>
    %cst_13 = arith.constant 0.000000e+00 : f32
    %23 = vector.broadcast %cst_13 : f32 to vector<8x128xf32>
    %24 = arith.maximumf %22, %23 : vector<8x128xf32>
    %c0_14 = arith.constant 0 : index
    %c0_15 = arith.constant 0 : index
    %25 = vector.load %arg7[%c0_14, %c0_15] : memref<1x128xf32, #tpu.memory_space<vmem>>, vector<1x128xf32>
    %26 = vector.broadcast %25 : vector<1x128xf32> to vector<8x128xf32>
    %27 = arith.subf %26, %19 : vector<8x128xf32>
    %cst_16 = arith.constant 0.000000e+00 : f32
    %28 = vector.broadcast %cst_16 : f32 to vector<8x128xf32>
    %29 = arith.maximumf %27, %28 : vector<8x128xf32>
    %30 = arith.mulf %24, %29 : vector<8x128xf32>
    %31 = arith.mulf %30, %30 : vector<8x128xf32>
    %c0_17 = arith.constant 0 : index
    %c0_18 = arith.constant 0 : index
    %32 = vector.load %arg8[%c0_17, %c0_18] : memref<128x8xf32, #tpu.memory_space<vmem>>, vector<128x8xf32>
    %cst_19 = arith.constant dense<0.000000e+00> : vector<8x8xf32>
    %33 = tpu.matmul %31, %32, %cst_19 {dimension_numbers = #tpu.dot_dimension_numbers<[1], [0], [0], [1], [0, 0, 1, 1], [], []>} : vector<8x128xf32>, vector<128x8xf32>, vector<8x8xf32> -> vector<8x8xf32>
    %c0_20 = arith.constant 0 : index
    %c0_21 = arith.constant 0 : index
    %34 = vector.load %arg9[%c0_20, %c0_21] : memref<1x8xf32, #tpu.memory_space<vmem>>, vector<1x8xf32>
    %35 = vector.broadcast %34 : vector<1x8xf32> to vector<8x8xf32>
    %36 = arith.addf %33, %35 : vector<8x8xf32>
    %c0_22 = arith.constant 0 : index
    %c0_23 = arith.constant 0 : index
    %37 = vector.load %arg10[%c0_22, %c0_23] : memref<8x8xf32, #tpu.memory_space<vmem>>, vector<8x8xf32>
    tpu.vector_store %arg10[%c0_22, %c0_23], %36 {strides = array<i32>} : memref<8x8xf32, #tpu.memory_space<vmem>>, vector<8x8xf32>,
    return
  }
  func.func @transform_0(%arg0: i32) -> (i32, i32) {
    %c0_i32 = arith.constant 0 : i32
    %c0_i32_0 = arith.constant 0 : i32
    return %arg0, %c0_i32 : i32, i32
  }
  func.func @transform_1(%arg0: i32) -> (i32, i32) {
    %c0_i32 = arith.constant 0 : i32
    %c0_i32_0 = arith.constant 0 : i32
    %c0_i32_1 = arith.constant 0 : i32
    return %c0_i32, %c0_i32_0 : i32, i32
  }
  func.func @transform_2(%arg0: i32) -> (i32, i32) {
    %c0_i32 = arith.constant 0 : i32
    %c0_i32_0 = arith.constant 0 : i32
    %c0_i32_1 = arith.constant 0 : i32
    return %c0_i32, %c0_i32_0 : i32, i32
  }
  func.func @transform_3(%arg0: i32) -> (i32, i32) {
    %c0_i32 = arith.constant 0 : i32
    %c0_i32_0 = arith.constant 0 : i32
    %c0_i32_1 = arith.constant 0 : i32
    return %c0_i32, %c0_i32_0 : i32, i32
  }
  func.func @transform_4(%arg0: i32) -> (i32, i32) {
    %c0_i32 = arith.constant 0 : i32
    %c0_i32_0 = arith.constant 0 : i32
    %c0_i32_1 = arith.constant 0 : i32
    return %c0_i32, %c0_i32_0 : i32, i32
  }
  func.func @transform_5(%arg0: i32) -> (i32, i32) {
    %c0_i32 = arith.constant 0 : i32
    %c0_i32_0 = arith.constant 0 : i32
    %c0_i32_1 = arith.constant 0 : i32
    return %c0_i32, %c0_i32_0 : i32, i32
  }
  func.func @transform_6(%arg0: i32) -> (i32, i32) {
    %c0_i32 = arith.constant 0 : i32
    %c0_i32_0 = arith.constant 0 : i32
    %c0_i32_1 = arith.constant 0 : i32
    return %c0_i32, %c0_i32_0 : i32, i32
  }
  func.func @transform_7(%arg0: i32) -> (i32, i32) {
    %c0_i32 = arith.constant 0 : i32
    %c0_i32_0 = arith.constant 0 : i32
    %c0_i32_1 = arith.constant 0 : i32
    return %c0_i32, %c0_i32_0 : i32, i32
  }
  func.func @transform_8(%arg0: i32) -> (i32, i32) {
    %c0_i32 = arith.constant 0 : i32
    %c0_i32_0 = arith.constant 0 : i32
    %c0_i32_1 = arith.constant 0 : i32
    return %c0_i32, %c0_i32_0 : i32, i32
  }
  func.func @transform_9(%arg0: i32) -> (i32, i32) {
    %c0_i32 = arith.constant 0 : i32
    %c0_i32_0 = arith.constant 0 : i32
    return %arg0, %c0_i32 : i32, i32
  }
}

</mosaic_0001>

<bundles_post_ra>
// kernel: tpu_custom_call.1
= control target key start
LH: loop header
LB: loop body
LE: loop exit
PB: predicated region body
PF: predicated region fallthrough
CT: control target
= control target key end

     0   :  { %s483_s11 = smov 4   ;;  %s484_s12 = smov 12   ;;  %v485_v4 = vmov 0.0|0.0   ;;  %s661_s0 = inlined_call_operand.vmem [shape: f32[8,4], index: 0, kind: input, shape index: {}]   ;;  %s662_s1 = inlined_call_operand.vmem [shape: f32[1,32], index: 1, kind: input, shape index: {}]   ;;  %s663_s2 = inlined_call_operand.vmem [shape: f32[1,32], index: 2, kind: input, shape index: {}]   ;;  %s664_s3 = inlined_call_operand.vmem [shape: f32[32,16], index: 3, kind: input, shape index: {}]   ;;  %s665_s4 = inlined_call_operand.vmem [shape: f32[1,16], index: 4, kind: input, shape index: {}]   ;;  %s666_s5 = inlined_call_operand.vmem [shape: f32[1,128], index: 5, kind: input, shape index: {}]   ;;  %s667_s6 = inlined_call_operand.vmem [shape: f32[1,128], index: 6, kind: input, shape index: {}]   ;;  %s668_s7 = inlined_call_operand.vmem [shape: f32[128,8], index: 7, kind: input, shape index: {}]   ;;  %s669_s8 = inlined_call_operand.vmem [shape: f32[1,8], index: 8, kind: input, shape index: {}]   ;;  %s670_s9 = inlined_call_operand.hbm [shape: f32[8,8], index: 9, kind: output, shape index: {}]  }
   0x1   :  { %v33_v0 = vld [vmem:[%s661_s0] sm:$0xff]  ;;  %v91_v2 = vld [vmem:[%s664_s3 + $0x8] sm:$0xff]  ;;  %v92_v3 = vld [vmem:[%s664_s3 + $0x10] sm:$0xff]  ;;  %412 = vmatprep.subr.bf16.mxu0 %v485_v4  ;;  %418 = vmatprep.subr.bf16.mxu1 %v485_v4 }
   0x2   :  { %35 = vrot.lane.b32.xlu0 %v33_v0, %s483_s11  ;;  %41 = vrot.lane.b32.xlu1 %v33_v0, %s484_s12  ;;  %v90_v1 = vld [vmem:[%s664_s3] sm:$0xff]  ;;  %v93_v6 = vld [vmem:[%s664_s3 + $0x18] sm:$0xff] }
   0x3   :  { %v413_v5 = vpack.c.bf16 %v91_v2, %v90_v1 }
   0x4   :  { %14 = vsyncpa [#allocation3], 0  ;;  %s486_s20 = smov 8   ;;  %s487_s21 = smov 16   ;;  %v416_v7 = vpack.c.bf16 %v93_v6, %v92_v3  ;;  %vm488_vm0 = vmmov 0   ;;  %v489_v8 = vmov 0.0  }
   0x5   :  { %414 = vmatpush3.bf16.msra.mxu0 %v413_v5  ;;  %374 = vmatprep.mubr.msk.f32.mxu0 %vm488_vm0, %v489_v8  ;;  %s490_s22 = smov 20   ;;  %s491_s23 = smov 24   ;;  %vm56_vm1 = vcmask 31744   ;;  %vm58_vm2 = vcmask 64512   ;;  %vm60_vm3 = vcmask 97280   ;;  %vm62_vm4 = vcmask 130048  }
   0x6   :  { %38 = vrot.lane.b32.xlu0 %v33_v0, %s486_s20  ;;  %44 = vrot.lane.b32.xlu1 %v33_v0, %s487_s21  ;;  %s492_s3 = smov 28   ;;  %vm64_vm5 = vcmask 162816   ;;  %vm66_vm6 = vcmask 195584   ;;  %vm68_vm7 = vcmask 228352   ;;  %v337_v20 = vld [vmem:[%s662_s1] ss:$0 sm:$0xff] }
   0x7   :  { %415 = vmatprep.subr.bf16.mxu0 %v485_v4  ;;  %409 = vmatprep.mubr.msk.f32.mxu1 %vm488_vm0, %v489_v8  ;;  %v338_v21 = vld [vmem:[%s663_s2] ss:$0 sm:$0xff]  ;;  %vm101_vm8 = vcmask 261120   ;;  %v230_v32 = vld [vmem:[%s668_s7 + $0x8] sm:$0xff]  ;;  %v231_v33 = vld [vmem:[%s668_s7 + $0x10] sm:$0xff]  ;;  %s493_s11 = smov 32  }
   0x8   :  { %v229_v31 = vld [vmem:[%s668_s7] sm:$0xff]  ;;  %v232_v35 = vld [vmem:[%s668_s7 + $0x18] sm:$0xff]  ;;  %v234_v38 = vld [vmem:[%s668_s7 + $0x28] sm:$0xff]  ;;  %s494_s15 = smov 64   ;;  %s495_s16 = smov 48   ;;  %vm199_vm9 = vcmask 392192  }
   0x9   :  { %417 = vmatpush3.bf16.msra.mxu0 %v416_v7  ;;  %v419_v34 = vpack.c.bf16 %v230_v32, %v229_v31  ;;  %v422_v36 = vpack.c.bf16 %v232_v35, %v231_v33  ;;  %v233_v37 = vld [vmem:[%s668_s7 + $0x20] sm:$0xff]  ;;  %v235_v40 = vld [vmem:[%s668_s7 + $0x30] sm:$0xff]  ;;  %v236_v41 = vld [vmem:[%s668_s7 + $0x38] sm:$0xff]  ;;  %s496_s17 = smov 96   ;;  %s498_s18 = smov 112   ;;  %vm201_vm10 = vcmask 523264  }
   0xa   :  { %47 = vrot.lane.b32.xlu0 %v33_v0, %s490_s22  ;;  %50 = vrot.lane.b32.xlu1 %v33_v0, %s491_s23  ;;  %v425_v39 = vpack.c.bf16 %v234_v38, %v233_v37  ;;  %v428_v42 = vpack.c.bf16 %v236_v41, %v235_v40  ;;  %v237_v43 = vld [vmem:[%s668_s7 + $0x40] sm:$0xff]  ;;  %v238_v44 = vld [vmem:[%s668_s7 + $0x48] sm:$0xff]  ;;  %vm203_vm11 = vcmask 654336   ;;  %vm205_vm12 = vcmask 785408  }
   0xb   :  { %420 = vmatpush3.bf16.msra.mxu1 %v419_v34  ;;  %v431_v45 = vpack.c.bf16 %v238_v44, %v237_v43  ;;  %v239_v46 = vld [vmem:[%s668_s7 + $0x50] sm:$0xff]  ;;  %v240_v47 = vld [vmem:[%s668_s7 + $0x58] sm:$0xff]  ;;  %v339_v48 = vld [vmem:[%s665_s4] ss:$0 sm:$0xff]  ;;  %vm207_vm13 = vcmask 916480  }
   0xc   :  { %421 = vmatprep.subr.bf16.mxu1 %v485_v4  ;;  %v434_v49 = vpack.c.bf16 %v240_v47, %v239_v46  ;;  %v241_v53 = vld [vmem:[%s668_s7 + $0x60] sm:$0xff]  ;;  %v242_v54 = vld [vmem:[%s668_s7 + $0x68] sm:$0xff]  ;;  %v243_v56 = vld [vmem:[%s668_s7 + $0x70] sm:$0xff] }
   0xd   :  { %v437_v55 = vpack.c.bf16 %v242_v54, %v241_v53  ;;  %v244_v57 = vld [vmem:[%s668_s7 + $0x78] sm:$0xff]  ;;  %v341_v6 = vld [vmem:[%s666_s5] ss:$0 sm:$0xff] }
   0xe   :  { %53 = vrot.lane.b32.xlu0 %v33_v0, %s492_s3  ;;  %v440_v58 = vpack.c.bf16 %v244_v57, %v243_v56  ;;  %v342_v7 = vld [vmem:[%s667_s6] ss:$0 sm:$0xff]  ;;  %s499_s3 = smov [#allocation2]  }
   0xf   :  { %423 = vmatpush3.bf16.msra.mxu1 %v422_v36  ;;  %s329_s5 = sshll.u32 %s499_s3, 4  ;;  %s330_s5 = int_to_ptr.vmem [resolvable:$true] %s329_s5 }
  0x10   :  { %424 = vmatprep.subr.bf16.mxu1 %v485_v4  ;;  %s459_s6 = scalar_lea.vmem %s330_s5, 128  ;;  %p464_p1 = scmp.lt.s32.totalorder %s330_s5, %s330_s5 }
  0x11   :  { %p460_p0 = scmp.ne.s32.totalorder %s330_s5, %s459_s6  ;;  %p465_p2 = scmp.lt.s32.totalorder %s459_s6, %s459_s6 }
  0x13   :  { %426 = vmatpush3.bf16.msra.mxu1 %v425_v39  ;;  %p466_p3 = por %p465_p2, %p464_p1 }
  0x14   :  { %427 = vmatprep.subr.bf16.mxu1 %v485_v4 }
  0x15   :  { %p467_p4 = pnand %p466_p3, %p460_p0 }
  0x17   :  { %429 = vmatpush3.bf16.msra.mxu1 %v428_v42 }
  0x18   :  { %430 = vmatprep.subr.bf16.mxu1 %v485_v4 }
  0x1b   :  { %432 = vmatpush3.bf16.msra.mxu1 %v431_v45 }
  0x1c   :  { %433 = vmatprep.subr.bf16.mxu1 %v485_v4 }
  0x1f   :  { %435 = vmatpush3.bf16.msra.mxu1 %v434_v49 }
  0x20   :  { %436 = vmatprep.subr.bf16.mxu1 %v485_v4 }
  0x23   :  { %438 = vmatpush3.bf16.msra.mxu1 %v437_v55 }
  0x24   :  { %439 = vmatprep.subr.bf16.mxu1 %v485_v4 }
  0x27   :  { %441 = vmatpush3.bf16.msra.mxu1 %v440_v58 }
  0x74   :  { %v36_v9 = vpop.permute.xlu0 %35  ;;  %v42_v10 = vpop.permute.xlu1 %41 }
  0x75   :  { %v57_v11 = vsel %vm56_vm1, %v33_v0, %v36_v9 }
  0x78   :  { %v39_v12 = vpop.permute.xlu0 %38  ;;  %v45_v13 = vpop.permute.xlu1 %44 }
  0x79   :  { %v59_v14 = vsel %vm58_vm2, %v57_v11, %v39_v12 }
  0x7a   :  { %v61_v15 = vsel %vm60_vm3, %v59_v14, %v42_v10 }
  0x7b   :  { %v63_v16 = vsel %vm62_vm4, %v61_v15, %v45_v13 }
  0x7c   :  { %v48_v17 = vpop.permute.xlu0 %47  ;;  %v51_v19 = vpop.permute.xlu1 %50 }
  0x7d   :  { %v65_v18 = vsel %vm64_vm5, %v63_v16, %v48_v17  ;;  %v343_v17 = vld [vmem:[%s669_s8] ss:$0 sm:$0xff] }
  0x7e   :  { %v67_v22 = vsel %vm66_vm6, %v65_v18, %v51_v19 }
  0x80   :  { %v54_v23 = vpop.permute.xlu0 %53 }
  0x81   :  { %v69_v24 = vsel %vm68_vm7, %v67_v22, %v54_v23 }
  0x82   :  { %v77_v25 = vsub.f32 %v69_v24, %v337_v20  ;;  %v86_v26 = vsub.f32 %v338_v21, %v69_v24 }
  0x84   :  { %v78_v27 = vmax.f32 %v77_v25, 0.0  ;;  %v87_v28 = vmax.f32 %v86_v26, 0.0 }
  0x86   :  { %v88_v29 = vmul.f32 %v87_v28, %v78_v27 }
  0x88   :  { %v89_v30 = vmul.f32 %v88_v29, %v88_v29 }
  0x8a   :  { %375 = vmatmul.mubr.msk.f32.vlgmr.msra.gmra.mrb[0].mxu0 %vm101_vm8, %v89_v30 }
 0x15d   :  { %v171_v50 = vpop.f32.mrb[0].mxu0 }
 0x15e   :  { %v172_v51 = vadd.f32 %v339_v48, %v171_v50  ;;  %v376_v52 = vpop.f32.mrb[1].mxu0 }
 0x160   :  { %179 = vrot.lane.b32.xlu0 %v172_v51, %s493_s11  ;;  %176 = vrot.lane.b32.xlu1 %v172_v51, %s487_s21  ;;  %s497_s21 = smov 80  }
 0x164   :  { %185 = vrot.lane.b32.xlu0 %v172_v51, %s494_s15  ;;  %182 = vrot.lane.b32.xlu1 %v172_v51, %s495_s16 }
 0x168   :  { %191 = vrot.lane.b32.xlu0 %v172_v51, %s496_s17  ;;  %188 = vrot.lane.b32.xlu1 %v172_v51, %s497_s21 }
 0x16c   :  { %194 = vrot.lane.b32.xlu1 %v172_v51, %s498_s18 }
 0x1d2   :  { %v180_v59 = vpop.permute.xlu0 %179  ;;  %v177_v60 = vpop.permute.xlu1 %176 }
 0x1d3   :  { %v197_v61 = vsel %vm62_vm4, %v172_v51, %v177_v60 }
 0x1d4   :  { %v198_v63 = vsel %vm101_vm8, %v197_v61, %v180_v59 }
 0x1d6   :  { %v186_v62 = vpop.permute.xlu0 %185  ;;  %v183_v0 = vpop.permute.xlu1 %182 }
 0x1d7   :  { %v200_v1 = vsel %vm199_vm9, %v198_v63, %v183_v0 }
 0x1d8   :  { %v202_v2 = vsel %vm201_vm10, %v200_v1, %v186_v62 }
 0x1da   :  { %v189_v3 = vpop.permute.xlu1 %188  ;;  %v192_v4 = vpop.permute.xlu0 %191 }
 0x1db   :  { %v204_v5 = vsel %vm203_vm11, %v202_v2, %v189_v3 }
 0x1dc   :  { %v206_v8 = vsel %vm205_vm12, %v204_v5, %v192_v4 }
 0x1de   :  { %v195_v9 = vpop.permute.xlu1 %194 }
 0x1df   :  { %v208_v10 = vsel %vm207_vm13, %v206_v8, %v195_v9 }
 0x1e0   :  { %v216_v11 = vsub.f32 %v208_v10, %v341_v6  ;;  %v225_v12 = vsub.f32 %v342_v7, %v208_v10 }
 0x1e2   :  { %v217_v13 = vmax.f32 %v216_v11, 0.0  ;;  %v226_v14 = vmax.f32 %v225_v12, 0.0 }
 0x1e4   :  { %v227_v15 = vmul.f32 %v226_v14, %v217_v13 }
 0x1e6   :  { %v228_v16 = vmul.f32 %v227_v15, %v227_v15 }
 0x1e8   :  { %410 = vmatmul.mubr.f32.vlgmr.msra.gmra.mrb[0].mxu1 %v228_v16 }
 0x2bb   :  { %v318_v18 = vpop.f32.mrb[0].mxu1 }
 0x2bc   :  { %v319_v19 = vadd.f32 %v343_v17, %v318_v18  ;;  %v411_v20 = vpop.f32.mrb[1].mxu1 }
 0x2be   :  { %322 = vst.msk [vmem:[#allocation2] sm:$0xff] %vm58_vm2, %v319_v19 }
 0x2bf   :  { %470 = shalt.err (!%p467_p4)
}
 0x2c0   :  { %s471_s26 = scalar_lea.hbm %s670_s9, 128 }
 0x2c1   :  { %p472_p5 = scmp.ne.s32.totalorder %s670_s9, %s471_s26  ;;  %p475_p6 = scmp.lt.u32.totalorder %s471_s26, %s670_s9 }
 0x2c3   :  { %p477_p7 = pnand %p475_p6, %p472_p5 }
 0x2c5   :  { %480 = shalt.err (!%p477_p7)
}
 0x2c6   :  { %332 = dma.vmem_to_hbm [thread:$0]  %s330_s5, 128, %s670_s9, [#allocation3]  }
 0x2c7   :  { %481 = dma.done.wait [#allocation3], 128  }
 0x2c8   :  { %482 = vsyncadd [#allocation3], 4294967168 }
 0x2c9   :  { %336 = vsyncpa [#allocation3], 1 }

</bundles_post_ra>
